<compile_context>
chip_gen: v7x
topology: tpu7x:2x2x1
jax: 0.10.0
libtpu: 0.0.40
codegen_flags: <defaults>
</compile_context>

<pallas_src>
import math

import jax
import jax.numpy as jnp
from jax.experimental import pallas as pl
from jax.experimental.pallas import tpu as pltpu

LANE = 128


def _round_up(a, m):
    return (a + m - 1) // m * m


# --------------------------------------------------------------------------
# Pallas kernels
# --------------------------------------------------------------------------
def _head_kernel(x_ref, w1_ref, b1_ref, w2_ref, b2_ref, o_ref):
    """Fused 1x1 conv -> ReLU -> (folded BN) -> 1x1 conv on a pixel tile.

    x_ref:  (TP, Cp)  bf16 pixel tile (channels zero-padded to 128 multiple)
    w1_ref: (Cp, Hp)  bf16;  b1_ref: (1, Hp)  f32
    w2_ref: (Hp, Kp)  bf16 (BatchNorm folded in);  b2_ref: (1, Kp)  f32
    o_ref:  (TP, Kp)  f32 logits, classes padded to 128 (lane-dense stores)
    """
    h = jnp.dot(x_ref[...], w1_ref[...],
                preferred_element_type=jnp.float32) + b1_ref[...]
    h = jnp.maximum(h, 0.0)                           # ReLU
    # BatchNorm2d (running stats) folded into w2/b2; Dropout == identity.
    y = jnp.dot(h.astype(w2_ref.dtype), w2_ref[...],
                preferred_element_type=jnp.float32) + b2_ref[...]
    o_ref[...] = y.astype(o_ref.dtype)


def _resize_kernel(m_ref, ry_ref, rx_ref, o_ref):
    """Bilinear resize of one batch, classes (padded) kept on the lane axis.

    m_ref:  (1, h, w*Kp)  logits of one image, NHWC-flat
    ry_ref: (H, h)        row interpolation matrix (align_corners=False)
    rx_ref: (W, w)        column interpolation matrix
    o_ref:  (1, H, W, Kp) resized logits, NHWC
    """
    kp = o_ref.shape[-1]
    hh, _ = ry_ref.shape                                   # H
    ww, w_in = rx_ref.shape                                # W, w
    m = m_ref[0]                                           # (h, w*Kp)
    # Row resize: one lane-dense 2-D matmul on the MXU.
    tmp = jnp.dot(ry_ref[...], m,
                  preferred_element_type=jnp.float32)      # (H, w*Kp)
    tmp = tmp.reshape(hh, w_in, kp)                        # (H, w, Kp)
    # Column resize: batched matmul over output rows, classes stay on lanes.
    rxb = jnp.broadcast_to(rx_ref[...], (hh, ww, w_in))    # (H, W, w)
    out = jnp.einsum("hcx,hxk->hck", rxb, tmp,
                     preferred_element_type=jnp.float32)   # (H, W, Kp)
    o_ref[0] = out.astype(o_ref.dtype)


# --------------------------------------------------------------------------
# Glue / wrapper
# --------------------------------------------------------------------------
def _bilinear_matrix(out_size, in_size):
    """Interpolation matrix matching F.interpolate(mode='bilinear',
    align_corners=False) along one axis."""
    i = jnp.arange(out_size, dtype=jnp.float32)
    src = (i + 0.5) * (in_size / out_size) - 0.5
    src = jnp.maximum(src, 0.0)
    x0 = jnp.floor(src)
    lam = src - x0
    x0i = jnp.clip(x0.astype(jnp.int32), 0, in_size - 1)
    x1i = jnp.clip(x0i + 1, 0, in_size - 1)
    mat = ((1.0 - lam)[:, None] * jax.nn.one_hot(x0i, in_size, dtype=jnp.float32)
           + lam[:, None] * jax.nn.one_hot(x1i, in_size, dtype=jnp.float32))
    return mat  # (out_size, in_size)


def segformer_head_forward(x, height, width, params, tile_p=512):
    f32, bf16 = jnp.float32, jnp.bfloat16
    B, N, C = x.shape
    h = w = int(math.isqrt(N))
    assert h * w == N
    hidden = params["w1"].shape[1]
    num_classes = params["w2"].shape[1]

    cp = _round_up(C, LANE)            # padded in-channels
    hp = _round_up(hidden, LANE)       # padded hidden
    kp = _round_up(num_classes, LANE)  # padded classes (lane-dense output)

    # ---- fold BatchNorm (eval mode, running stats) into the classifier -----
    scale = params["bn_scale"].reshape(-1).astype(f32)          # (hidden,)
    shift = params["bn_shift"].reshape(-1).astype(f32)
    w2f = params["w2"].astype(f32) * scale[:, None]             # (hidden, K)
    b2f = (params["b2"].reshape(1, -1).astype(f32)
           + shift @ params["w2"].astype(f32))                  # (1, K)

    # ---- zero-pad channel dims to lane multiples; bf16 MXU operands --------
    w1p = jnp.zeros((cp, hp), f32).at[:C, :hidden].set(
        params["w1"].astype(f32)).astype(bf16)
    b1p = jnp.zeros((1, hp), f32).at[:, :hidden].set(
        params["b1"].reshape(1, -1).astype(f32))
    w2p = jnp.zeros((hp, kp), f32).at[:hidden, :num_classes].set(w2f).astype(bf16)
    b2p = jnp.zeros((1, kp), f32).at[:, :num_classes].set(b2f)

    # ---- pixel tiling: big tiles, cdiv grid, but keep >= 2 parallel steps ---
    P = B * N
    tile = max(8, min(_round_up(tile_p, 8), _round_up(max(P // 2, 1), 8)))
    num_tiles = pl.cdiv(P, tile)
    pp = num_tiles * tile

    x_pad = jnp.zeros((pp, cp), bf16).at[:P, :C].set(
        x.reshape(P, C).astype(bf16))

    cparams = pltpu.CompilerParams(
        dimension_semantics=("parallel",),
        vmem_limit_bytes=48 * 1024 * 1024,   # > v5e 16 MiB default, < v7x 64 MiB
    )

    logits = pl.pallas_call(
        _head_kernel,
        out_shape=jax.ShapeDtypeStruct((pp, kp), f32),
        grid=(num_tiles,),
        in_specs=[
            pl.BlockSpec((tile, cp), lambda i: (i, 0)),
            pl.BlockSpec((cp, hp), lambda i: (0, 0)),
            pl.BlockSpec((1, hp), lambda i: (0, 0)),
            pl.BlockSpec((hp, kp), lambda i: (0, 0)),
            pl.BlockSpec((1, kp), lambda i: (0, 0)),
        ],
        out_specs=pl.BlockSpec((tile, kp), lambda i: (i, 0)),
        compiler_params=cparams,
    )(x_pad, w1p, b1p, w2p, b2p)

    # NHWC-flat logits, padded classes on lanes.  No transpose between the two
    # pallas_calls -- slice + reshape below are contiguity-preserving.
    planes = logits[:P].reshape(B, h, w * kp)

    ry = _bilinear_matrix(height, h)     # (H, h)
    rx = _bilinear_matrix(width, w)      # (W, w)

    out_nhwc = pl.pallas_call(
        _resize_kernel,
        out_shape=jax.ShapeDtypeStruct((B, height, width, kp), f32),
        grid=(B,),
        in_specs=[
            pl.BlockSpec((1, h, w * kp), lambda b: (b, 0, 0)),
            pl.BlockSpec((height, h), lambda b: (0, 0)),
            pl.BlockSpec((width, w), lambda b: (0, 0)),
        ],
        out_specs=pl.BlockSpec((1, height, width, kp), lambda b: (b, 0, 0, 0)),
        compiler_params=cparams,
    )(planes, ry, rx)

    # Drop class padding; single NHWC -> NCHW transpose at the very end.
    return out_nhwc[..., :num_classes].transpose(0, 3, 1, 2)


def _reference_forward(x, height, width, params):
    """Pure-JAX reference of the module (eval mode).  MXU operands are rounded
    to bf16 exactly like the kernel, so the comparison is precision-matched."""
    f32, bf16 = jnp.float32, jnp.bfloat16
    B, N, C = x.shape
    h = w = int(math.isqrt(N))
    K = params["w2"].shape[1]
    scale = params["bn_scale"].reshape(-1).astype(f32)
    shift = params["bn_shift"].reshape(-1).astype(f32)
    w1 = params["w1"].astype(bf16).astype(f32)
    b1 = params["b1"].reshape(1, -1).astype(f32)
    w2 = (params["w2"].astype(f32) * scale[:, None]).astype(bf16).astype(f32)
    b2 = params["b2"].reshape(1, -1).astype(f32) + shift @ params["w2"].astype(f32)
    xf = x.reshape(B * N, C).astype(bf16).astype(f32)
    hdn = jnp.maximum(xf @ w1 + b1, 0.0)
    hdn = hdn.astype(bf16).astype(f32)          # kernel feeds bf16 to 2nd matmul
    logits = hdn @ w2 + b2
    planes = logits.reshape(B, h, w, K).transpose(0, 3, 1, 2)
    ry = _bilinear_matrix(height, h)
    rx = _bilinear_matrix(width, w)
    return jnp.einsum("Hh,bkhw,Ww->bkHW", ry, planes, rx)


# --------------------------------------------------------------------------
# Main
# --------------------------------------------------------------------------
if __name__ == "__main__":
    # Small shapes consistent with the module: x is (B, N, C) with N = h*w.
    B, N, C = 2, 64, 32                 # h = w = 8
    hidden_size, num_classes = 64, 16
    height, width = 16, 16

    key = jax.random.PRNGKey(0)
    ks = jax.random.split(key, 9)

    w1 = 0.1 * jax.random.normal(ks[0], (C, hidden_size), jnp.float32)
    b1 = 0.1 * jax.random.normal(ks[1], (1, hidden_size), jnp.float32)
    gamma = 1.0 + 0.1 * jax.random.normal(ks[2], (1, hidden_size), jnp.float32)
    beta = 0.1 * jax.random.normal(ks[3], (1, hidden_size), jnp.float32)
    running_mean = 0.1 * jax.random.normal(ks[4], (1, hidden_size), jnp.float32)
    running_var = 1.0 + 0.1 * jnp.abs(
        jax.random.normal(ks[5], (1, hidden_size), jnp.float32))
    eps = 1e-5
    bn_scale = gamma / jnp.sqrt(running_var + eps)
    bn_shift = beta - running_mean * bn_scale
    w2 = 0.1 * jax.random.normal(ks[6], (hidden_size, num_classes), jnp.float32)
    b2 = 0.1 * jax.random.normal(ks[7], (1, num_classes), jnp.float32)

    params = dict(w1=w1, b1=b1, bn_scale=bn_scale, bn_shift=bn_shift,
                  w2=w2, b2=b2)

    x = jax.random.normal(ks[8], (B, N, C), jnp.float32)

    out = jax.block_until_ready(segformer_head_forward(x, height, width, params))
    assert out.shape == (B, num_classes, height, width), out.shape

    ref = jax.block_until_ready(_reference_forward(x, height, width, params))
    # Tolerance absorbs bf16-operand / MXU-pass / accumulation-order effects.
    max_err = jnp.max(jnp.abs(out - ref))
    assert jnp.allclose(out, ref, atol=1e-2, rtol=1e-2), (
        f"kernel mismatch, max |err| = {max_err}")

    print("KERNEL_OK")
</pallas_src>

<mosaic_0001>
module attributes {stable_mosaic.version = 11 : i64} {
  func.func @_head_kernel(%arg0: i32, %arg1: memref<64x128xbf16, #tpu.memory_space<vmem>>, %arg2: memref<128x128xbf16, #tpu.memory_space<vmem>>, %arg3: memref<1x128xf32, #tpu.memory_space<vmem>>, %arg4: memref<128x128xbf16, #tpu.memory_space<vmem>>, %arg5: memref<1x128xf32, #tpu.memory_space<vmem>>, %arg6: memref<64x128xf32, #tpu.memory_space<vmem>>) attributes {dimension_semantics = [#tpu.dimension_semantics<parallel>], iteration_bounds = array<i64: 2>, scalar_prefetch = 0 : i64, scratch_operands = 0 : i64, tpu.core_type = #tpu.core_type<tc>, window_params = [{transform_indices = @transform_0, window_bounds = array<i64: 64, 128>}, {pipeline_mode = #tpu.pipeline_mode<synchronous>, transform_indices = @transform_1, window_bounds = array<i64: 128, 128>}, {pipeline_mode = #tpu.pipeline_mode<synchronous>, transform_indices = @transform_2, window_bounds = array<i64: 1, 128>}, {pipeline_mode = #tpu.pipeline_mode<synchronous>, transform_indices = @transform_3, window_bounds = array<i64: 128, 128>}, {pipeline_mode = #tpu.pipeline_mode<synchronous>, transform_indices = @transform_4, window_bounds = array<i64: 1, 128>}, {transform_indices = @transform_5, window_bounds = array<i64: 64, 128>}]} {
    %c0 = arith.constant 0 : index
    %c0_0 = arith.constant 0 : index
    %0 = vector.load %arg1[%c0, %c0_0] : memref<64x128xbf16, #tpu.memory_space<vmem>>, vector<64x128xbf16>
    %c0_1 = arith.constant 0 : index
    %c0_2 = arith.constant 0 : index
    %1 = vector.load %arg2[%c0_1, %c0_2] : memref<128x128xbf16, #tpu.memory_space<vmem>>, vector<128x128xbf16>
    %cst = arith.constant dense<0.000000e+00> : vector<64x128xf32>
    %2 = tpu.matmul %0, %1, %cst {dimension_numbers = #tpu.dot_dimension_numbers<[1], [0], [0], [1], [0, 0, 1, 1], [], []>} : vector<64x128xbf16>, vector<128x128xbf16>, vector<64x128xf32> -> vector<64x128xf32>
    %c0_3 = arith.constant 0 : index
    %c0_4 = arith.constant 0 : index
    %3 = vector.load %arg3[%c0_3, %c0_4] : memref<1x128xf32, #tpu.memory_space<vmem>>, vector<1x128xf32>
    %4 = vector.broadcast %3 : vector<1x128xf32> to vector<64x128xf32>
    %5 = arith.addf %2, %4 : vector<64x128xf32>
    %cst_5 = arith.constant 0.000000e+00 : f32
    %6 = vector.broadcast %cst_5 : f32 to vector<64x128xf32>
    %7 = arith.maximumf %5, %6 : vector<64x128xf32>
    %8 = arith.truncf %7 : vector<64x128xf32> to vector<64x128xbf16>
    %c0_6 = arith.constant 0 : index
    %c0_7 = arith.constant 0 : index
    %9 = vector.load %arg4[%c0_6, %c0_7] : memref<128x128xbf16, #tpu.memory_space<vmem>>, vector<128x128xbf16>
    %cst_8 = arith.constant dense<0.000000e+00> : vector<64x128xf32>
    %10 = tpu.matmul %8, %9, %cst_8 {dimension_numbers = #tpu.dot_dimension_numbers<[1], [0], [0], [1], [0, 0, 1, 1], [], []>} : vector<64x128xbf16>, vector<128x128xbf16>, vector<64x128xf32> -> vector<64x128xf32>
    %c0_9 = arith.constant 0 : index
    %c0_10 = arith.constant 0 : index
    %11 = vector.load %arg5[%c0_9, %c0_10] : memref<1x128xf32, #tpu.memory_space<vmem>>, vector<1x128xf32>
    %12 = vector.broadcast %11 : vector<1x128xf32> to vector<64x128xf32>
    %13 = arith.addf %10, %12 : vector<64x128xf32>
    %c0_11 = arith.constant 0 : index
    %c0_12 = arith.constant 0 : index
    %14 = vector.load %arg6[%c0_11, %c0_12] : memref<64x128xf32, #tpu.memory_space<vmem>>, vector<64x128xf32>
    tpu.vector_store %arg6[%c0_11, %c0_12], %13 {strides = array<i32>} : memref<64x128xf32, #tpu.memory_space<vmem>>, vector<64x128xf32>,
    return
  }
  func.func @transform_0(%arg0: i32) -> (i32, i32) {
    %c0_i32 = arith.constant 0 : i32
    %c0_i32_0 = arith.constant 0 : i32
    return %arg0, %c0_i32 : i32, i32
  }
  func.func @transform_1(%arg0: i32) -> (i32, i32) {
    %c0_i32 = arith.constant 0 : i32
    %c0_i32_0 = arith.constant 0 : i32
    %c0_i32_1 = arith.constant 0 : i32
    return %c0_i32, %c0_i32_0 : i32, i32
  }
  func.func @transform_2(%arg0: i32) -> (i32, i32) {
    %c0_i32 = arith.constant 0 : i32
    %c0_i32_0 = arith.constant 0 : i32
    %c0_i32_1 = arith.constant 0 : i32
    return %c0_i32, %c0_i32_0 : i32, i32
  }
  func.func @transform_3(%arg0: i32) -> (i32, i32) {
    %c0_i32 = arith.constant 0 : i32
    %c0_i32_0 = arith.constant 0 : i32
    %c0_i32_1 = arith.constant 0 : i32
    return %c0_i32, %c0_i32_0 : i32, i32
  }
  func.func @transform_4(%arg0: i32) -> (i32, i32) {
    %c0_i32 = arith.constant 0 : i32
    %c0_i32_0 = arith.constant 0 : i32
    %c0_i32_1 = arith.constant 0 : i32
    return %c0_i32, %c0_i32_0 : i32, i32
  }
  func.func @transform_5(%arg0: i32) -> (i32, i32) {
    %c0_i32 = arith.constant 0 : i32
    %c0_i32_0 = arith.constant 0 : i32
    return %arg0, %c0_i32 : i32, i32
  }
}

</mosaic_0001>

<bundles_post_ra>
// kernel: tpu_custom_call.1
= control target key start
LH: loop header
LB: loop body
LE: loop exit
PB: predicated region body
PF: predicated region fallthrough
CT: control target
= control target key end

     0   :  { %10 = vsyncpa [#allocation3], 0  ;;  %s1362_s0 = inlined_call_operand.hbm [shape: bf16[128,128], index: 0, kind: input, shape index: {}]   ;;  %s1363_s1 = inlined_call_operand.hbm [shape: bf16[128,128], index: 1, kind: input, shape index: {}]   ;;  %s1364_s2 = inlined_call_operand.vmem [shape: f32[1,128], index: 2, kind: input, shape index: {}]   ;;  %s1365_s3 = inlined_call_operand.hbm [shape: bf16[128,128], index: 3, kind: input, shape index: {}]   ;;  %s1366_s4 = inlined_call_operand.vmem [shape: f32[1,128], index: 4, kind: input, shape index: {}]   ;;  %s1367_s5 = inlined_call_operand.hbm [shape: f32[128,128], index: 5, kind: output, shape index: {}]  }
   0x1   :  { %12 = vsyncpa [#allocation3 + $0x1], 0 }
   0x2   :  { %13 = vsyncpa [#allocation6], 0 }
   0x3   :  { %14 = vsyncpa [#allocation4], 0 }
   0x4   :  { %16 = vsyncpa [#allocation4 + $0x1], 0  ;;  %s1106_s18 = smov 0   ;;  %s1108_s19 = smov 0  }
   0x5   :  { %s1110_s20 = smov 0   ;;  %s1112_s21 = smov 0  }
   0x6 LB: > { %s1127_s22 = sadd.s32 4294967295, %s1066_s21   ;;  %s705_s23 = sadd.s32 4294967294, %s1066_s21   ;;  %s1066_s21 = sphi %s1112_s21, %s1387_s21   ;;  %s1062_s20 = sphi %s1110_s20, %s1386_s20   ;;  %s1058_s19 = sphi %s1108_s19, %s1385_s19   ;;  %s1054_s18 = sphi %s1106_s18, %s1384_s18  }
   0x7   : > { %p42_p0 = scmp.ne.s32.totalorder %s1058_s19, %s1054_s18  ;;  %p1368_p1 = scmp.eq.s32.totalorder %s1127_s22, 0 }
   0x8   : > { %p156_p3 = scmp.eq.s32.totalorder %s705_s23, 1  ;;  %p706_p5 = scmp.ge.s32.totalorder %s1066_s21, 1 }
   0x9   : > { %p1136_p4 = por %p1368_p1, %p42_p0  ;;  %p163_p7 = scmp.lt.s32.totalorder %s1066_s21, 3 }
   0xa   : > { %p1141_p6 = por %p156_p3, %p42_p0  ;;  %s1068_s27 = smov [#allocation5]  }
   0xb   : > { %s1371_s24 = scalar_select %p1136_p4, 1, 0 }
   0xc   : > { %s1372_s25 = scalar_select %p1141_p6, 1, 0 }
   0xd   : > { %p1146_p8 = pnand %p706_p5, %p163_p7  ;;  %s175_s28 = sshll.u32 %s1068_s27, 4  ;;  %s1150_s28 = int_to_ptr.vmem [resolvable:$true] %s175_s28 }
   0xe   : > { %s1069_s30 = smov [#allocation7]   ;;  %s910_s9 = scalar_lea.hbm %s1363_s1, 1024 }
   0xf   : > { %p831_p9 = pneg %p1146_p8  ;;  %s191_s6 = sshll.u32 %s1069_s30, 4  ;;  %s1161_s6 = int_to_ptr.vmem [resolvable:$true] %s191_s6 }
  0x10   : > { %p911_p12 = scmp.ne.s32.totalorder %s1363_s1, %s910_s9  ;;  %p917_p5 = scmp.lt.u32.totalorder %s910_s9, %s1363_s1 }
  0x11   : > { %p1157_p11 = pnand %p831_p9, %p1368_p1 }
  0x13   : > { %p912_p13 = pneg %p1157_p11 }
  0x15   : > { %p913_p0 = pnand %p912_p13, %p911_p12 }
  0x17   : > { %p914_p3 = pneg %p913_p0 }
  0x19   : > { %p919_p7 = pnand %p917_p5, %p914_p3 }
  0x1b   : > { %922 = shalt.err (!%p919_p7)
}
  0x1c   : > { %s923_s14 = scalar_lea.vmem %s1150_s28, 1024  ;;  %p931_p2 = scmp.lt.s32.totalorder %s1150_s28, %s1150_s28 }
  0x1d   : > { %p924_p9 = scmp.ne.s32.totalorder %s1150_s28, %s923_s14  ;;  %p932_p12 = scmp.lt.s32.totalorder %s923_s14, %s923_s14 }
  0x1f   : > { %p926_p10 = pnand %p924_p9, %p912_p13  ;;  %p933_p0 = por %p932_p12, %p931_p2 }
  0x21   : > { %p927_p1 = pneg %p926_p10 }
  0x23   : > { %p934_p6 = pnand %p933_p0, %p927_p1 }
  0x25   : > { %937 = shalt.err (!%p934_p6)
}
  0x26   : > { %s1070_s15 = smov 64   ;;  %s1071_s16 = smov 4  }
  0x27   : > { %834 = dma.hbm_to_vmem [thread:$0]  (!%p1157_p11), %s1363_s1, 1024, %s1150_s28, [#allocation6], %s1070_s15, %s1070_s15, %s1071_s16  }
  0x28   : > { %s938_s7 = scalar_lea.hbm %s1365_s3, 1024 }
  0x29   : > { %p939_p1 = scmp.ne.s32.totalorder %s1365_s3, %s938_s7  ;;  %p945_p10 = scmp.lt.u32.totalorder %s938_s7, %s1365_s3 }
  0x2b   : > { %p941_p2 = pnand %p939_p1, %p912_p13 }
  0x2d   : > { %p942_p6 = pneg %p941_p2 }
  0x2f   : > { %p947_p3 = pnand %p945_p10, %p942_p6 }
  0x31   : > { %950 = shalt.err (!%p947_p3)
}
  0x32   : > { %s951_s28 = scalar_lea.vmem %s1161_s6, 1024  ;;  %p959_p12 = scmp.lt.s32.totalorder %s1161_s6, %s1161_s6 }
  0x33   : > { %p952_p5 = scmp.ne.s32.totalorder %s1161_s6, %s951_s28  ;;  %p960_p0 = scmp.lt.s32.totalorder %s951_s28, %s951_s28 }
  0x35   : > { %p954_p7 = pnand %p952_p5, %p912_p13  ;;  %p961_p1 = por %p960_p0, %p959_p12 }
  0x37   : > { %p955_p9 = pneg %p954_p7 }
  0x39   : > { %p962_p2 = pnand %p961_p1, %p955_p9 }
  0x3b   : > { %965 = shalt.err (!%p962_p2)
}
  0x3c   : > { %837 = dma.hbm_to_vmem [thread:$0]  (!%p1157_p11), %s1365_s3, 1024, %s1161_s6, [#allocation6], %s1070_s15, %s1070_s15, %s1071_s16  }
  0x3d   : > { %s1222_s29 = sadd.s32 1, %s1066_s21   ;;  %s29_s14 = sadd.s32 1, %s1062_s20 }
  0x3e   : > { %s26_s17 = ssub.s32 %s1066_s21, %s1222_s29  ;;  %p36_p13 = scmp.ne.s32.totalorder %s1062_s20, %s1058_s19 }
  0x3f   : > { %p27_p6 = scmp.eq.s32.totalorder %s26_s17, 0  ;;  %p37_p10 = scmp.eq.s32.totalorder %s1066_s21, 0 }
  0x40   : > { %p1375_p3 = scmp.eq.s32.totalorder %s1127_s22, 1  ;;  %p848_p7 = scmp.lt.s32.totalorder %s1066_s21, 2 }
  0x41   : > { %s1238_s27 = scalar_select %p27_p6, %s1062_s20, %s29_s14  }
  0x42   : > { %p1232_p5 = por %p1375_p3, %p36_p13  ;;  %p38_p9 = por %p37_p10, %p36_p13 }
  0x43   : > { %s208_s30 = sand.u32 1, %s1062_s20   ;;  %s745_s6 = sshll.u32 %s1066_s21, 9 }
  0x44   : > { %s1376_s23 = scalar_select %p1232_p5, 1, 0 }
  0x45   : > { %s710_s7 = sshll.u32 %s208_s30, 5  ;;  %s1245_s10 = scalar_lea.hbm %s1362_s0, %s745_s6 }
  0x46   : > { %s212_s11 = scalar_lea.vmem [#allocation2], %s710_s7  ;;  %p1249_p11 = pnand %p848_p7, %p38_p9 }
  0x47   : > { %s219_s28 = sshll.u32 %s212_s11, 4  ;;  %s1253_s13 = scalar_lea.sflag [#allocation3], %s208_s30  ;;  %s1247_s28 = int_to_ptr.vmem [resolvable:$true] %s219_s28 }
  0x48   : > { %s966_s14 = scalar_lea.hbm %s1245_s10, 512  ;;  %p968_p0 = pneg %p1249_p11 }
  0x49   : > { %p967_p12 = scmp.ne.s32.totalorder %s1245_s10, %s966_s14  ;;  %s971_s6 = scalar_lea.hbm %s1362_s0, 1024 }
  0x4a   : > { %p972_p13 = scmp.lt.u32.totalorder %s1245_s10, %s1362_s0  ;;  %p973_p6 = scmp.lt.u32.totalorder %s971_s6, %s966_s14 }
  0x4b   : > { %p969_p1 = pnand %p968_p0, %p967_p12  ;;  %p975_p3 = scmp.lt.u32.totalorder %s966_s14, %s1245_s10 }
  0x4c   : > { %p974_p10 = por %p973_p6, %p972_p13 }
  0x4d   : > { %p970_p2 = pneg %p969_p1 }
  0x4e   : > { %p976_p7 = por %p975_p3, %p974_p10 }
  0x50   : > { %p977_p9 = pnand %p976_p7, %p970_p2 }
  0x52   : > { %980 = shalt.err (!%p977_p9)
}
  0x53   : > { %s981_s30 = scalar_lea.vmem %s1247_s28, 512  ;;  %s1072_s11 = smov [#allocation2]  }
  0x54   : > { %p982_p12 = scmp.ne.s32.totalorder %s1247_s28, %s981_s30  ;;  %s986_s17 = sshll.u32 %s1072_s11, 4  ;;  %s987_s17 = int_to_ptr.vmem [resolvable:$false] %s986_s17 }
  0x55   : > { %s988_s7 = scalar_lea.vmem %s987_s17, 1024  ;;  %p989_p4 = scmp.lt.s32.totalorder %s1247_s28, %s987_s17 }
  0x56   : > { %p984_p1 = pnand %p982_p12, %p968_p0  ;;  %p990_p13 = scmp.lt.s32.totalorder %s988_s7, %s981_s30 }
  0x58   : > { %p985_p5 = pneg %p984_p1  ;;  %p991_p6 = por %p990_p13, %p989_p4 }
  0x5a   : > { %p992_p10 = pnand %p991_p6, %p985_p5 }
  0x5c   : > { %995 = shalt.err (!%p992_p10)
}
  0x5d   : > { %841 = dma.hbm_to_vmem [thread:$0]  (!%p1249_p11), %s1245_s10, 512, %s1247_s28, %s1253_s13, %s1070_s15, %s1070_s15, %s1071_s16  }
  0x5e   : > { %231 = sbr.rel (%p1146_p8) target bundleno = 600 (0x258), region = 40  ;;  %s1287_s14 = sand.u32 (!%p1146_p8), 1, %s1058_s19  }
  0x5f   : > { %s714_s6 = sshll.u32 (!%p1146_p8), %s1287_s14, 5  ;;  %s234_s8 = scalar_lea.sflag (!%p1146_p8), [#allocation3], %s1287_s14 }
  0x60   : > { %s1291_s9 = scalar_lea.vmem (!%p1146_p8), [#allocation2], %s714_s6  ;;  %p1378_p4 = scmp.ne.s32.totalorder (!%p1146_p8), %s1371_s24, 0 }
  0x65   : > { %1041 = dma.done.wait (%p1378_p4), %s234_s8, 512  }
  0x66   : > { %1043 = vsyncadd (%p1378_p4), %s234_s8, 4294966784  ;;  %p1379_p5 = scmp.eq.s32.totalorder %s1127_s22, 0 }
  0x68   : > { %1045 = dma.done.wait (%p1379_p5), [#allocation6], 2048   ;;  %p1380_p8 = pmov %p1379_p5 }
  0x69   : > { %v890_v0 = vld [vmem:[#allocation5] sm:$0xff]   ;;  %v891_v1 = vld [vmem:[#allocation5 + $0x8] sm:$0xff]   ;;  %v892_v2 = vld [vmem:[#allocation5 + $0x10] sm:$0xff]   ;;  %s717_s15 = sshll.u32 %s1287_s14, 6  ;;  %s746_s13 = sshll.u32 %s1127_s22, 10 }
  0x6a   : > { %1047 = vsyncadd (%p1380_p8), [#allocation6], 4294965248  ;;  %771 = vmatprep.subr.bf16.mxu0 %v890_v0  ;;  %v893_v3 = vld [vmem:[#allocation5 + $0x18] sm:$0xff]   ;;  %v898_v4 = vld [vmem:[%s1291_s9] sm:$0xff]   ;;  %s271_s28 = scalar_lea.vmem [#allocation8], %s717_s15  ;;  %s1318_s17 = scalar_lea.hbm %s1367_s5, %s746_s13 }
  0x6b   : > { %772 = vmatpush3.bf16.msra.mxu0 %v890_v0  ;;  %787 = vmatprep.mubr.bf16.mxu0 %v898_v4  ;;  %v894_v5 = vld [vmem:[#allocation5 + $0x20] sm:$0xff]   ;;  %v903_v7 = vld [vmem:[#allocation7 + $0x8] sm:$0xff]   ;;  %v904_v9 = vld [vmem:[#allocation7 + $0x10] sm:$0xff]   ;;  %s613_s12 = sshll.u32 %s271_s28, 4  ;;  %s600_s22 = scalar_lea.sflag [#allocation4], %s1287_s14  ;;  %s1313_s12 = int_to_ptr.vmem [resolvable:$true] %s613_s12 }
  0x6c   : > { %773 = vmatprep.subr.bf16.mxu0 %v891_v1  ;;  %v902_v6 = vld [vmem:[#allocation7] sm:$0xff]   ;;  %v895_v8 = vld [vmem:[#allocation5 + $0x28] sm:$0xff]   ;;  %v896_v10 = vld [vmem:[#allocation5 + $0x30] sm:$0xff]   ;;  %s996_s7 = scalar_lea.vmem %s1313_s12, 1024  ;;  %p1381_p0 = scmp.ne.s32.totalorder %s1376_s23, 0 }
  0x6d   : > { %795 = vmatprep.subr.bf16.mxu1 %v902_v6  ;;  %v905_v11 = vld [vmem:[#allocation7 + $0x18] sm:$0xff]   ;;  %v906_v13 = vld [vmem:[#allocation7 + $0x20] sm:$0xff]   ;;  %v907_v14 = vld [vmem:[#allocation7 + $0x28] sm:$0xff]   ;;  %p997_p11 = scmp.ne.s32.totalorder %s1313_s12, %s996_s7  ;;  %s1073_s6 = smov [#allocation8]  }
  0x6e   : > { %796 = vmatpush3.bf16.msra.mxu1 %v902_v6  ;;  %v897_v12 = vld [vmem:[#allocation5 + $0x38] sm:$0xff]   ;;  %v899_v15 = vld [vmem:[%s1291_s9 + $0x8] sm:$0xff]   ;;  %v900_v16 = vld [vmem:[%s1291_s9 + $0x10] sm:$0xff]   ;;  %s1000_s8 = sshll.u32 %s1073_s6, 4  ;;  %s1001_s8 = int_to_ptr.vmem [resolvable:$false] %s1000_s8 }
  0x6f   : > { %774 = vmatpush3.bf16.msra.mxu0 %v891_v1  ;;  %797 = vmatprep.subr.bf16.mxu1 %v903_v7  ;;  %v901_v17 = vld [vmem:[%s1291_s9 + $0x18] sm:$0xff]   ;;  %v908_v18 = vld [vmem:[#allocation7 + $0x30] sm:$0xff]   ;;  %v718_v20 = vld [vmem:[%s1364_s2] ss:$0 sm:$0xff]  ;;  %p998_p2 = pnand %p997_p11, %p1381_p0  ;;  %s1002_s9 = scalar_lea.vmem %s1001_s8, 2048 }
  0x70   : > { %775 = vmatprep.subr.bf16.mxu0 %v892_v2  ;;  %v909_v19 = vld [vmem:[#allocation7 + $0x38] sm:$0xff]   ;;  %v731_v49 = vld [vmem:[%s1366_s4] ss:$0 sm:$0xff]  ;;  %p1003_p7 = scmp.lt.s32.totalorder %s1313_s12, %s1001_s8  ;;  %p1004_p9 = scmp.lt.s32.totalorder %s1002_s9, %s996_s7 }
  0x71   : > { %p999_p3 = pneg %p998_p2 }
  0x72   : > { %798 = vmatpush3.bf16.msra.mxu1 %v903_v7  ;;  %p1005_p12 = por %p1004_p9, %p1003_p7 }
  0x73   : > { %776 = vmatpush3.bf16.msra.mxu0 %v892_v2  ;;  %799 = vmatprep.subr.bf16.mxu1 %v904_v9 }
  0x74   : > { %777 = vmatprep.subr.bf16.mxu0 %v893_v3  ;;  %p1006_p1 = pnand %p1005_p12, %p999_p3 }
  0x76   : > { %800 = vmatpush3.bf16.msra.mxu1 %v904_v9 }
  0x77   : > { %778 = vmatpush3.bf16.msra.mxu0 %v893_v3  ;;  %801 = vmatprep.subr.bf16.mxu1 %v905_v11 }
  0x78   : > { %779 = vmatprep.subr.bf16.mxu0 %v894_v5 }
  0x7a   : > { %802 = vmatpush3.bf16.msra.mxu1 %v905_v11 }
  0x7b   : > { %780 = vmatpush3.bf16.msra.mxu0 %v894_v5  ;;  %803 = vmatprep.subr.bf16.mxu1 %v906_v13 }
  0x7c   : > { %781 = vmatprep.subr.bf16.mxu0 %v895_v8 }
  0x7e   : > { %804 = vmatpush3.bf16.msra.mxu1 %v906_v13 }
  0x7f   : > { %782 = vmatpush3.bf16.msra.mxu0 %v895_v8  ;;  %805 = vmatprep.subr.bf16.mxu1 %v907_v14 }
  0x80   : > { %783 = vmatprep.subr.bf16.mxu0 %v896_v10 }
  0x82   : > { %806 = vmatpush3.bf16.msra.mxu1 %v907_v14 }
  0x83   : > { %784 = vmatpush3.bf16.msra.mxu0 %v896_v10  ;;  %807 = vmatprep.subr.bf16.mxu1 %v908_v18 }
  0x84   : > { %785 = vmatprep.subr.bf16.mxu0 %v897_v12 }
  0x86   : > { %808 = vmatpush3.bf16.msra.mxu1 %v908_v18 }
  0x87   : > { %786 = vmatpush3.bf16.msra.mxu0 %v897_v12  ;;  %809 = vmatprep.subr.bf16.mxu1 %v909_v19 }
  0x8a   : > { %788 = vmatmul.mubr.bf16.vlgmr.msra.gmra.mrb[0].mxu0 %v899_v15  ;;  %810 = vmatpush3.bf16.msra.mxu1 %v909_v19 }
  0x8b   : > { %791 = vmatprep.mubr.bf16.mxu0 %v900_v16 }
  0x92   : > { %792 = vmatmul.mubr.bf16.gmra.mrb[4].mxu0 %v901_v17 }
 0x15d   : > { %v789_v21 = vpop.f32.mrb[0].mxu0 }
 0x15e   : > { %v421_v22 = vadd.f32 %v789_v21, %v718_v20  ;;  %v412_v23 = vpop.f32.mrb[1].mxu0 }
 0x15f   : > { %v413_v24 = vadd.f32 %v718_v20, %v412_v23  ;;  %v790_v25 = vpop.f32.mrb[2].mxu0 }
 0x160   : > { %v424_v26 = vadd.f32 %v790_v25, %v718_v20  ;;  %v415_v27 = vpop.f32.mrb[3].mxu0  ;;  %v445_v29 = vmax.f32 %v421_v22, 0.0 }
 0x161   : > { %v416_v28 = vadd.f32 %v718_v20, %v415_v27  ;;  %v443_v31 = vmax.f32 %v413_v24, 0.0 }
 0x162   : > { %v446_v30 = vmax.f32 %v424_v26, 0.0 }
 0x163   : > { %v444_v32 = vmax.f32 %v416_v28, 0.0 }
 0x164   : > { %v452_v33 = vpack.c.bf16 %v446_v30, %v445_v29 }
 0x165   : > { %v793_v34 = vpop.f32.mrb[4].mxu0  ;;  %v451_v35 = vpack.c.bf16 %v444_v32, %v443_v31 }
 0x166   : > { %v437_v36 = vadd.f32 %v793_v34, %v718_v20  ;;  %v428_v37 = vpop.f32.mrb[5].mxu0 }
 0x167   : > { %v429_v38 = vadd.f32 %v718_v20, %v428_v37  ;;  %v794_v39 = vpop.f32.mrb[6].mxu0  ;;  %811 = vmatprep.mubr.bf16.mxu1 %v451_v35 }
 0x168   : > { %v440_v40 = vadd.f32 %v794_v39, %v718_v20  ;;  %v431_v41 = vpop.f32.mrb[7].mxu0  ;;  %812 = vmatmul.mubr.bf16.vlgmr.msra.gmra.mrb[0].mxu1 %v452_v33  ;;  %v449_v43 = vmax.f32 %v437_v36, 0.0 }
 0x169   : > { %v432_v42 = vadd.f32 %v718_v20, %v431_v41  ;;  %v447_v45 = vmax.f32 %v429_v38, 0.0 }
 0x16a   : > { %v450_v44 = vmax.f32 %v440_v40, 0.0 }
 0x16b   : > { %v448_v46 = vmax.f32 %v432_v42, 0.0 }
 0x16c   : > { %v454_v47 = vpack.c.bf16 %v450_v44, %v449_v43 }
 0x16d   : > { %v453_v48 = vpack.c.bf16 %v448_v46, %v447_v45 }
 0x16f   : > { %815 = vmatprep.mubr.bf16.mxu1 %v453_v48 }
 0x170   : > { %816 = vmatmul.mubr.bf16.gmra.mrb[4].mxu1 %v454_v47 }
 0x23b   : > { %v813_v50 = vpop.f32.mrb[0].mxu1 }
 0x23c   : > { %v569_v51 = vadd.f32 %v813_v50, %v731_v49  ;;  %v560_v52 = vpop.f32.mrb[1].mxu1 }
 0x23d   : > { %v561_v53 = vadd.f32 %v731_v49, %v560_v52  ;;  %v814_v54 = vpop.f32.mrb[2].mxu1 }
 0x23e   : > { %593 = vst [vmem:[%s271_s28 + $0x10] sm:$0xff] %v569_v51  ;;  %v572_v55 = vadd.f32 %v814_v54, %v731_v49  ;;  %v563_v56 = vpop.f32.mrb[3].mxu1 }
 0x23f   : > { %591 = vst [vmem:[%s271_s28] sm:$0xff] %v561_v53  ;;  %v564_v57 = vadd.f32 %v731_v49, %v563_v56 }
 0x240   : > { %594 = vst [vmem:[%s271_s28 + $0x18] sm:$0xff] %v572_v55 }
 0x241   : > { %592 = vst [vmem:[%s271_s28 + $0x8] sm:$0xff] %v564_v57 }
 0x243   : > { %v817_v58 = vpop.f32.mrb[4].mxu1 }
 0x244   : > { %v585_v59 = vadd.f32 %v817_v58, %v731_v49  ;;  %v576_v60 = vpop.f32.mrb[5].mxu1 }
 0x245   : > { %v577_v61 = vadd.f32 %v731_v49, %v576_v60  ;;  %v818_v62 = vpop.f32.mrb[6].mxu1 }
 0x246   : > { %597 = vst [vmem:[%s271_s28 + $0x30] sm:$0xff] %v585_v59  ;;  %v588_v63 = vadd.f32 %v818_v62, %v731_v49  ;;  %v579_v0 = vpop.f32.mrb[7].mxu1 }
 0x247   : > { %595 = vst [vmem:[%s271_s28 + $0x20] sm:$0xff] %v577_v61  ;;  %v580_v1 = vadd.f32 %v731_v49, %v579_v0 }
 0x248   : > { %598 = vst [vmem:[%s271_s28 + $0x38] sm:$0xff] %v588_v63 }
 0x249   : > { %596 = vst [vmem:[%s271_s28 + $0x28] sm:$0xff] %v580_v1 }
 0x24a   : > { %1009 = shalt.err (!%p1006_p1)
}
 0x24b   : > { %s1010_s24 = scalar_lea.hbm %s1318_s17, 1024  ;;  %s1014_s16 = scalar_lea.hbm %s1367_s5, 2048 }
 0x24c   : > { %p1011_p13 = scmp.ne.s32.totalorder %s1318_s17, %s1010_s24  ;;  %p1015_p4 = scmp.lt.u32.totalorder %s1318_s17, %s1367_s5 }
 0x24d   : > { %p1016_p5 = scmp.lt.u32.totalorder %s1014_s16, %s1010_s24  ;;  %p1018_p11 = scmp.lt.u32.totalorder %s1010_s24, %s1318_s17 }
 0x24e   : > { %p1012_p6 = pnand %p1011_p13, %p1381_p0 }
 0x24f   : > { %p1017_p8 = por %p1016_p5, %p1015_p4 }
 0x250   : > { %p1013_p10 = pneg %p1012_p6 }
 0x251   : > { %p1019_p2 = por %p1018_p11, %p1017_p8 }
 0x253   : > { %p1020_p3 = pnand %p1019_p2, %p1013_p10 }
 0x255   : > { %1023 = shalt.err (!%p1020_p3)
}
 0x256   : > { %s1074_s13 = smov 128   ;;  %s1075_s30 = smov 8  }
 0x257   : > { %829 = dma.vmem_to_hbm [thread:$0]  (%p1381_p0), %s1313_s12, 1024, %s1318_s17, %s600_s22, %s1074_s13, %s1074_s13, %s1075_s30  }
 0x258 PF: > { %s628_s11 = sand.u32 1, %s1054_s18   ;;  %p1382_p7 = scmp.ne.s32.totalorder %s1372_s25, 0 }
 0x259   : > { %p1383_p9 = scmp.ge.s32.totalorder %s1066_s21, 2  ;;  %s629_s7 = scalar_lea.sflag [#allocation4], %s628_s11 }
 0x25b   : > { %p843_p12 = pnand %p1383_p9, %p1382_p7 }
 0x25d   : > { %1049 = dma.done.wait (!%p843_p12), %s629_s7, 1024  }
 0x25e   : > { %1051 = vsyncadd (!%p843_p12), %s629_s7, 4294966272  ;;  %p19_p1 = scmp.ge.s32.totalorder %s1222_s29, 4   ;;  %s1384_s18 = smov %s1058_s19 }
 0x25f   : > { %s1385_s19 = smov %s1062_s20  ;;  %s1386_s20 = smov %s1238_s27 }
 0x260   : > { %s1387_s21 = smov %s1222_s29  ;;  %21 = sbr.rel (!%p19_p1) target bundleno = 6 (0x6), region = 93 }
 0x267   :  { %634 = vsyncpa [#allocation3], 1 }
 0x268   :  { %636 = vsyncpa [#allocation3 + $0x1], 1 }
 0x269   :  { %637 = vsyncpa [#allocation6], 1 }
 0x26a   :  { %638 = vsyncpa [#allocation4], 1 }
 0x26b   :  { %640 = vsyncpa [#allocation4 + $0x1], 1 }

</bundles_post_ra>
